<compile_context>
chip_gen: v7x
topology: tpu7x:2x2x1
jax: 0.10.0
libtpu: 0.0.40
codegen_flags: <defaults>
</compile_context>

<pallas_src>
import functools
import math

import numpy as np
import jax
import jax.numpy as jnp
from jax import lax
from jax.experimental import pallas as pl
from jax.experimental.pallas import tpu as pltpu


# ----------------------------------------------------------------------------
# Kernel 1: latent-KV / rotary-PE cache (one fused GEMM + RMSNorm + RoPE)
#           output layout: [ kv_norm(kv) (C) | k_rope_re | k_rope_im | zeros ]
# ----------------------------------------------------------------------------
def _kv_cache_kernel(x_ref, wkv_ref, kvw_ref, cs_ref, cache_ref,
                     *, C, R, RH, RP, eps):
    x = x_ref[0]                                                         # (TS, D) bf16
    kvpe = jnp.dot(x, wkv_ref[...], preferred_element_type=jnp.float32)  # (TS, C+R)

    # RMSNorm on the latent part.
    kv = kvpe[:, :C]
    ms = jnp.mean(kv * kv, axis=-1, keepdims=True)
    kvn = kv * lax.rsqrt(ms + eps) * kvw_ref[...]                        # (TS, C) f32

    # RoPE on the de-interleaved rope part.
    kr = kvpe[:, C:C + RH]
    ki = kvpe[:, C + RH:C + R]
    cos = cs_ref[:, :RH]
    sin = cs_ref[:, RH:2 * RH]
    k_r = kr * cos - ki * sin
    k_i = kr * sin + ki * cos

    # Lane-aligned slice writes (C and RP are multiples of 128): no full-width
    # concatenate, no masked store on the wide latent part.
    cache_ref[0, :, 0:C] = kvn.astype(cache_ref.dtype)
    parts = [k_r, k_i]
    if RP > R:
        parts.append(jnp.zeros((k_r.shape[0], RP - R), jnp.float32))
    cache_ref[0, :, C:] = jnp.concatenate(parts, axis=-1).astype(cache_ref.dtype)


# ----------------------------------------------------------------------------
# Kernel 2: attention + output projection, grid = (batch, q_tile, head, kv_tile)
#           online (flash-style) softmax over kv tiles, heads accumulated into
#           an f32 VMEM accumulator, output written once per (batch, q_tile).
# ----------------------------------------------------------------------------
def _mla_attn_kernel(x_ref, cache_ref, wq_ref, wbk_ref, wbv_ref, wo_ref, cs_ref,
                     out_ref, q_sc, m_sc, l_sc, ctx_sc, acc_sc,
                     *, DN, R, RH, RP, C, TQ, TKV):
    t = pl.program_id(1)
    h = pl.program_id(2)
    kv = pl.program_id(3)
    n_h = pl.num_programs(2)
    n_kv = pl.num_programs(3)

    bf16, f32 = jnp.bfloat16, jnp.float32

    @pl.when(jnp.logical_and(h == 0, kv == 0))
    def _():
        acc_sc[...] = jnp.zeros_like(acc_sc)

    # --- per-(batch, q-tile, head) prologue: fused q projection + RoPE +
    #     W^UK absorb, assembled into a lane-aligned VMEM scratch.  softmax_scale
    #     is already folded into wq on the host. ---
    @pl.when(kv == 0)
    def _():
        x = x_ref[0]                                                     # (TQ, D) bf16
        q = jnp.dot(x, wq_ref[0], preferred_element_type=f32)            # (TQ, DN+R)
        q_nope = q[:, :DN]
        qr = q[:, DN:DN + RH]
        qi = q[:, DN + RH:DN + R]
        cos = cs_ref[:, :RH]
        sin = cs_ref[:, RH:2 * RH]
        q_r = qr * cos - qi * sin
        q_i = qr * sin + qi * cos

        q_abs = jnp.dot(q_nope.astype(bf16), wbk_ref[0],
                        preferred_element_type=f32)                      # (TQ, C)
        q_sc[:, 0:C] = q_abs.astype(bf16)
        parts = [q_r, q_i]
        if RP > R:
            parts.append(jnp.zeros((TQ, RP - R), f32))
        q_sc[:, C:] = jnp.concatenate(parts, axis=-1).astype(bf16)

        m_sc[...] = jnp.full_like(m_sc, -jnp.inf)
        l_sc[...] = jnp.zeros_like(l_sc)
        ctx_sc[...] = jnp.zeros_like(ctx_sc)

    # --- online softmax over this kv tile (skip tiles entirely above the
    #     causal diagonal; start_pos == 0 prefill) ---
    not_masked = kv * TKV <= t * TQ + (TQ - 1)

    @pl.when(not_masked)
    def _():
        k_cat = cache_ref[0]                                             # (TKV, C+RP) bf16
        q_cat = q_sc[...]                                                # (TQ,  C+RP) bf16
        s = lax.dot_general(q_cat, k_cat, (((1,), (1,)), ((), ())),
                            preferred_element_type=f32)                  # (TQ, TKV)

        row = lax.broadcasted_iota(jnp.int32, (TQ, TKV), 0) + t * TQ
        col = lax.broadcasted_iota(jnp.int32, (TQ, TKV), 1) + kv * TKV
        s = jnp.where(col <= row, s, -1e30)

        m_prev = m_sc[...]
        m_new = jnp.maximum(m_prev, jnp.max(s, axis=-1, keepdims=True))
        alpha = jnp.exp(m_prev - m_new)
        p = jnp.exp(s - m_new)
        l_sc[...] = alpha * l_sc[...] + jnp.sum(p, axis=-1, keepdims=True)
        ctx_sc[...] = alpha * ctx_sc[...] + jnp.dot(
            p.astype(bf16), k_cat[:, :C], preferred_element_type=f32)    # (TQ, C)
        m_sc[...] = m_new

    # --- per-head finalize: normalize, project through W^UV and wo, accumulate ---
    @pl.when(kv == n_kv - 1)
    def _():
        inv_l = pl.reciprocal(l_sc[...], approx=True)                    # EUP slot
        ctx = (ctx_sc[...] * inv_l).astype(bf16)                         # (TQ, C)
        oh = jnp.dot(ctx, wbv_ref[0], preferred_element_type=f32).astype(bf16)   # (TQ, V)
        acc_sc[...] += jnp.dot(oh, wo_ref[0], preferred_element_type=f32)        # (TQ, D)

    @pl.when(jnp.logical_and(h == n_h - 1, kv == n_kv - 1))
    def _():
        out_ref[0] = acc_sc[...].astype(out_ref.dtype)


# ----------------------------------------------------------------------------
# Wrapper: host-side weight re-layout (pure glue) + two pallas_calls
# ----------------------------------------------------------------------------
def mla_forward_pallas(x, wq, wkva, kv_norm_w, wkvb, wo, cos, sin, *,
                       n_heads, qk_nope_head_dim, qk_rope_head_dim,
                       v_head_dim, kv_lora_rank, softmax_scale,
                       tq=256, tkv=4096):
    B, S, D = x.shape
    H, DN, R, V, C = (n_heads, qk_nope_head_dim, qk_rope_head_dim,
                      v_head_dim, kv_lora_rank)
    assert R % 2 == 0
    RH = R // 2
    assert C % 128 == 0, "kv_lora_rank must be a multiple of 128 (lane alignment)"
    RP = max(128, ((R + 127) // 128) * 128)      # padded rope width (128-multiple)
    CPR = C + RP                                 # cache / q_cat width (128-multiple)
    CS = RP                                      # padded width of merged cos|sin table

    TQ = min(tq, S)
    assert S % TQ == 0 and (TQ % 8 == 0 or TQ == S)
    T = S // TQ
    TKV = min(tkv, S)
    assert S % TKV == 0 and (TKV % 8 == 0 or TKV == S)
    NKV = S // TKV

    f32, bf16 = jnp.float32, jnp.bfloat16

    # --- host-side weight re-layout (pure glue) ---
    # wq rows per head are [DN nope | R rope interleaved]; de-interleave rope into
    # [real halves | imag halves] (inner-product-invariant) and fold softmax_scale
    # into the weight (scores are linear in q through RoPE and the W^UK absorb).
    wq3 = wq.astype(f32).reshape(H, DN + R, D) * softmax_scale
    wq_h = jnp.transpose(
        jnp.concatenate([wq3[:, :DN, :], wq3[:, DN + 0::2, :], wq3[:, DN + 1::2, :]],
                        axis=1), (0, 2, 1)).astype(bf16)                 # (H, D, DN+R)

    wkv_all = jnp.concatenate([wkva[:C, :], wkva[C + 0::2, :], wkva[C + 1::2, :]],
                              axis=0).T                                  # (D, C+R) bf16
    kvw = kv_norm_w.reshape(1, C).astype(f32)

    wkvb3 = wkvb.reshape(H, DN + V, C)
    wbk = wkvb3[:, :DN, :]                                               # (H, DN, C)
    wbv = jnp.transpose(wkvb3[:, DN:, :], (0, 2, 1))                     # (H, C, V)
    wo_h = wo.T.reshape(H, V, D)                                         # (H, V, D)

    # Merged + lane-padded cos|sin table: one (S, CS) input instead of two
    # chronically under-filled 16/32-lane blocks.
    cs_parts = [cos, sin]
    if CS > 2 * RH:
        cs_parts.append(jnp.zeros((S, CS - 2 * RH), f32))
    cs = jnp.concatenate(cs_parts, axis=-1)                              # (S, CS)

    # ---- kernel 1: fused, lane-aligned kv_cache / pe_cache ----
    cache = pl.pallas_call(
        functools.partial(_kv_cache_kernel, C=C, R=R, RH=RH, RP=RP, eps=1e-6),
        out_shape=jax.ShapeDtypeStruct((B, S, CPR), bf16),
        grid_spec=pltpu.PrefetchScalarGridSpec(
            num_scalar_prefetch=0,
            grid=(B, T),
            in_specs=[
                pl.BlockSpec((1, TQ, D), lambda b, t: (b, t, 0)),        # x seq tile
                pl.BlockSpec((D, C + R), lambda b, t: (0, 0)),           # fused wkv_a
                pl.BlockSpec((1, C), lambda b, t: (0, 0)),               # kv_norm weight
                pl.BlockSpec((TQ, CS), lambda b, t: (t, 0)),             # cos|sin
            ],
            out_specs=pl.BlockSpec((1, TQ, CPR), lambda b, t: (b, t, 0)),
        ),
        compiler_params=pltpu.CompilerParams(
            dimension_semantics=("parallel", "parallel")),
    )(x, wkv_all, kvw, cs)

    # ---- kernel 2: flash attention + output projection over (B, T, H, KV) ----
    out = pl.pallas_call(
        functools.partial(_mla_attn_kernel, DN=DN, R=R, RH=RH, RP=RP, C=C,
                          TQ=TQ, TKV=TKV),
        out_shape=jax.ShapeDtypeStruct((B, S, D), bf16),
        grid_spec=pltpu.PrefetchScalarGridSpec(
            num_scalar_prefetch=0,
            grid=(B, T, H, NKV),
            in_specs=[
                pl.BlockSpec((1, TQ, D), lambda b, t, h, k: (b, t, 0)),       # x q-tile
                pl.BlockSpec((1, TKV, CPR), lambda b, t, h, k: (b, k, 0)),    # cache tile
                pl.BlockSpec((1, D, DN + R), lambda b, t, h, k: (h, 0, 0)),   # wq   (per head)
                pl.BlockSpec((1, DN, C), lambda b, t, h, k: (h, 0, 0)),       # W^UK (per head)
                pl.BlockSpec((1, C, V), lambda b, t, h, k: (h, 0, 0)),        # W^UV (per head)
                pl.BlockSpec((1, V, D), lambda b, t, h, k: (h, 0, 0)),        # wo   (per head)
                pl.BlockSpec((TQ, CS), lambda b, t, h, k: (t, 0)),            # cos|sin
            ],
            out_specs=pl.BlockSpec((1, TQ, D), lambda b, t, h, k: (b, t, 0)),
            scratch_shapes=[
                pltpu.VMEM((TQ, CPR), bf16),      # q_cat [q_abs | q_r | q_i | 0]
                pltpu.VMEM((TQ, 1), f32),         # m  (running max)
                pltpu.VMEM((TQ, 1), f32),         # l  (running denom)
                pltpu.VMEM((TQ, C), f32),         # ctx (running context)
                pltpu.VMEM((TQ, D), f32),         # acc (output accumulator over heads)
            ],
        ),
        compiler_params=pltpu.CompilerParams(
            dimension_semantics=("parallel", "parallel", "arbitrary", "arbitrary"),
            vmem_limit_bytes=48 * 1024 * 1024),
    )(x, cache, wq_h, wbk, wbv, wo_h, cs)
    return out


# ----------------------------------------------------------------------------
# Pure-JAX reference (mirrors the PyTorch module; all dots on f32 operands)
# ----------------------------------------------------------------------------
def _bf16_round(v):
    return v.astype(jnp.bfloat16).astype(jnp.float32)


def _rope_interleaved(xq, cos, sin):
    # xq: (B, S, Hn, R) f32 with interleaved (re, im) pairs; cos/sin: (S, R//2).
    xr, xi = xq[..., 0::2], xq[..., 1::2]
    c = cos[None, :, None, :]
    s = sin[None, :, None, :]
    yr = xr * c - xi * s
    yi = xr * s + xi * c
    y = jnp.stack([yr, yi], axis=-1).reshape(xq.shape)
    return _bf16_round(y)


def mla_forward_ref(x, wq, wkva, kv_norm_w, wkvb, wo, cos, sin, mask, *,
                    n_heads, qk_nope_head_dim, qk_rope_head_dim,
                    v_head_dim, kv_lora_rank, softmax_scale):
    B, S, D = x.shape
    H, DN, R, V, C = (n_heads, qk_nope_head_dim, qk_rope_head_dim,
                      v_head_dim, kv_lora_rank)
    f32 = jnp.float32
    xf = x.astype(f32)
    wqf, wkvaf, wkvbf, wof = (w.astype(f32) for w in (wq, wkva, wkvb, wo))

    q = _bf16_round(jnp.einsum('bsd,od->bso', xf, wqf)).reshape(B, S, H, DN + R)
    q_nope, q_pe = q[..., :DN], q[..., DN:]
    q_pe = _rope_interleaved(q_pe, cos, sin)

    kvpe = _bf16_round(jnp.einsum('bsd,od->bso', xf, wkvaf))
    kv, k_pe = kvpe[..., :C], kvpe[..., C:]
    k_pe = _rope_interleaved(k_pe[:, :, None, :], cos, sin)[:, :, 0, :]

    kvn = _bf16_round(kv * lax.rsqrt(jnp.mean(kv * kv, -1, keepdims=True) + 1e-6)
                      * kv_norm_w.astype(f32))

    wkvb3 = wkvbf.reshape(H, DN + V, C)
    q_abs = _bf16_round(jnp.einsum('bshd,hdc->bshc', q_nope, wkvb3[:, :DN]))
    scores = (jnp.einsum('bshc,btc->bsht', q_abs, kvn)
              + jnp.einsum('bshr,btr->bsht', q_pe, k_pe)) * softmax_scale
    scores = scores + mask[None, :, None, :]
    p = _bf16_round(jax.nn.softmax(scores, axis=-1))

    ctx = _bf16_round(jnp.einsum('bsht,btc->bshc', p, kvn))
    o = _bf16_round(jnp.einsum('bshc,hdc->bshd', ctx, wkvb3[:, DN:]))
    o = o.reshape(B, S, H * V)
    return jnp.einsum('bsv,dv->bsd', o, wof).astype(jnp.bfloat16)


# ----------------------------------------------------------------------------
# Main
# ----------------------------------------------------------------------------
if __name__ == "__main__":
    # Small, MLA-consistent configuration (synthetic ModelArgs).  Small tq/tkv
    # are used so the multi-q-tile, multi-kv-tile (flash) and causal-skip paths
    # are all exercised; production defaults are tq=256, tkv=4096.
    B, S = 2, 32
    D = 256            # args.dim
    H = 4              # args.n_heads (world_size == 1 -> n_local_heads == H)
    DN = 64            # args.qk_nope_head_dim
    R = 32             # args.qk_rope_head_dim
    V = 64             # args.v_head_dim
    C = 128            # args.kv_lora_rank
    softmax_scale = (DN + R) ** -0.5   # max_seq_len <= original_seq_len -> no mscale

    key = jax.random.PRNGKey(0)
    k0, k1, k2, k3, k4 = jax.random.split(key, 5)

    def init_w(k, shape, fan_in):
        return (jax.random.normal(k, shape, jnp.float32) / math.sqrt(fan_in)).astype(jnp.bfloat16)

    # Parameter shapes exactly as in MLA.__init__ (PyTorch: (out_features, in_features))
    wq = init_w(k0, (H * (DN + R), D), D)          # self.wq
    wkva = init_w(k1, (C + R, D), D)               # self.wkv_a
    wkvb = init_w(k2, (H * (DN + V), C), C)        # self.wkv_b
    wo = init_w(k3, (D, H * V), H * V)             # self.wo
    kv_norm_w = jnp.ones((C,), jnp.float32)        # self.kv_norm.weight (init = ones)

    x = jax.random.normal(k4, (B, S, D), jnp.float32).astype(jnp.bfloat16)

    # freqs_cis as cos/sin tables (precompute_freqs_cis, no YaRN correction here)
    theta = 10000.0
    inv_freq = 1.0 / (theta ** (np.arange(0, R, 2, dtype=np.float32) / R))
    ang = np.outer(np.arange(S, dtype=np.float32), inv_freq)
    cos = jnp.asarray(np.cos(ang), jnp.float32)    # (S, R//2)
    sin = jnp.asarray(np.sin(ang), jnp.float32)    # (S, R//2)

    # causal mask used only by the reference (the kernel builds it via iota)
    mask = jnp.triu(jnp.full((S, S), -1e30, jnp.float32), k=1)

    cfg = dict(n_heads=H, qk_nope_head_dim=DN, qk_rope_head_dim=R,
               v_head_dim=V, kv_lora_rank=C, softmax_scale=softmax_scale)

    out = mla_forward_pallas(x, wq, wkva, kv_norm_w, wkvb, wo, cos, sin,
                             tq=16, tkv=8, **cfg)
    out = jax.block_until_ready(out)

    ref = mla_forward_ref(x, wq, wkva, kv_norm_w, wkvb, wo, cos, sin, mask, **cfg)
    ref = jax.block_until_ready(ref)

    np.testing.assert_allclose(np.asarray(out, np.float32), np.asarray(ref, np.float32),
                               atol=1e-1, rtol=1e-1)
    print("KERNEL_OK")
</pallas_src>

<mosaic_0001>
module attributes {stable_mosaic.version = 11 : i64} {
  func.func @_kv_cache_kernel(%arg0: i32, %arg1: i32, %arg2: memref<1x16x256xbf16, #tpu.memory_space<vmem>>, %arg3: memref<256x160xbf16, #tpu.memory_space<vmem>>, %arg4: memref<1x128xf32, #tpu.memory_space<vmem>>, %arg5: memref<16x128xf32, #tpu.memory_space<vmem>>, %arg6: memref<1x16x256xbf16, #tpu.memory_space<vmem>>) attributes {dimension_semantics = [#tpu.dimension_semantics<parallel>, #tpu.dimension_semantics<parallel>], iteration_bounds = array<i64: 2, 2>, scalar_prefetch = 0 : i64, scratch_operands = 0 : i64, tpu.core_type = #tpu.core_type<tc>, window_params = [{transform_indices = @transform_0, window_bounds = array<i64: 1, 16, 256>}, {pipeline_mode = #tpu.pipeline_mode<synchronous>, transform_indices = @transform_1, window_bounds = array<i64: 256, 160>}, {pipeline_mode = #tpu.pipeline_mode<synchronous>, transform_indices = @transform_2, window_bounds = array<i64: 1, 128>}, {transform_indices = @transform_3, window_bounds = array<i64: 16, 128>}, {transform_indices = @transform_4, window_bounds = array<i64: 1, 16, 256>}]} {
    %c0 = arith.constant 0 : index
    %c0_0 = arith.constant 0 : index
    %c0_1 = arith.constant 0 : index
    %0 = vector.load %arg2[%c0, %c0_0, %c0_1] : memref<1x16x256xbf16, #tpu.memory_space<vmem>>, vector<1x16x256xbf16>
    %1 = vector.shape_cast %0 : vector<1x16x256xbf16> to vector<16x256xbf16>
    %c0_2 = arith.constant 0 : index
    %c0_3 = arith.constant 0 : index
    %2 = vector.load %arg3[%c0_2, %c0_3] : memref<256x160xbf16, #tpu.memory_space<vmem>>, vector<256x160xbf16>
    %cst = arith.constant dense<0.000000e+00> : vector<16x160xf32>
    %3 = tpu.matmul %1, %2, %cst {dimension_numbers = #tpu.dot_dimension_numbers<[1], [0], [0], [1], [0, 0, 1, 1], [], []>} : vector<16x256xbf16>, vector<256x160xbf16>, vector<16x160xf32> -> vector<16x160xf32>
    %4 = vector.extract_strided_slice %3 {offsets = [0, 0], sizes = [16, 128], strides = [1, 1]} : vector<16x160xf32> to vector<16x128xf32>
    %5 = arith.mulf %4, %4 : vector<16x128xf32>
    %cst_4 = arith.constant dense<0.000000e+00> : vector<16xf32>
    %6 = vector.multi_reduction <add>, %5, %cst_4 [1] : vector<16x128xf32> to vector<16xf32>
    %7 = vector.shape_cast %6 : vector<16xf32> to vector<16x1xf32>
    %cst_5 = arith.constant 1.280000e+02 : f32
    %8 = vector.broadcast %cst_5 : f32 to vector<16x1xf32>
    %9 = arith.divf %7, %8 : vector<16x1xf32>
    %cst_6 = arith.constant 9.99999997E-7 : f32
    %10 = vector.broadcast %cst_6 : f32 to vector<16x1xf32>
    %11 = arith.addf %9, %10 : vector<16x1xf32>
    %12 = math.rsqrt %11 : vector<16x1xf32>
    %13 = vector.broadcast %12 : vector<16x1xf32> to vector<16x128xf32>
    %14 = arith.mulf %4, %13 : vector<16x128xf32>
    %c0_7 = arith.constant 0 : index
    %c0_8 = arith.constant 0 : index
    %15 = vector.load %arg4[%c0_7, %c0_8] : memref<1x128xf32, #tpu.memory_space<vmem>>, vector<1x128xf32>
    %16 = vector.broadcast %15 : vector<1x128xf32> to vector<16x128xf32>
    %17 = arith.mulf %14, %16 : vector<16x128xf32>
    %18 = vector.extract_strided_slice %3 {offsets = [0, 128], sizes = [16, 16], strides = [1, 1]} : vector<16x160xf32> to vector<16x16xf32>
    %19 = vector.extract_strided_slice %3 {offsets = [0, 144], sizes = [16, 16], strides = [1, 1]} : vector<16x160xf32> to vector<16x16xf32>
    %c0_9 = arith.constant 0 : index
    %c0_10 = arith.constant 0 : index
    %20 = vector.load %arg5[%c0_9, %c0_10] : memref<16x128xf32, #tpu.memory_space<vmem>>, vector<16x16xf32>
    %c0_11 = arith.constant 0 : index
    %c16 = arith.constant 16 : index
    %21 = vector.load %arg5[%c0_11, %c16] : memref<16x128xf32, #tpu.memory_space<vmem>>, vector<16x16xf32>
    %22 = arith.mulf %18, %20 : vector<16x16xf32>
    %23 = arith.mulf %19, %21 : vector<16x16xf32>
    %24 = arith.subf %22, %23 : vector<16x16xf32>
    %25 = arith.mulf %18, %21 : vector<16x16xf32>
    %26 = arith.mulf %19, %20 : vector<16x16xf32>
    %27 = arith.addf %25, %26 : vector<16x16xf32>
    %28 = arith.truncf %17 : vector<16x128xf32> to vector<16x128xbf16>
    %c0_12 = arith.constant 0 : index
    %c0_13 = arith.constant 0 : index
    %c0_14 = arith.constant 0 : index
    %29 = vector.load %arg6[%c0_12, %c0_13, %c0_14] : memref<1x16x256xbf16, #tpu.memory_space<vmem>>, vector<1x16x128xbf16>
    %30 = vector.shape_cast %29 : vector<1x16x128xbf16> to vector<16x128xbf16>
    %31 = vector.shape_cast %28 : vector<16x128xbf16> to vector<1x16x128xbf16>
    tpu.vector_store %arg6[%c0_12, %c0_13, %c0_14], %31 {strides = array<i32>} : memref<1x16x256xbf16, #tpu.memory_space<vmem>>, vector<1x16x128xbf16>,
    %cst_15 = arith.constant 0.000000e+00 : f32
    %32 = vector.broadcast %cst_15 : f32 to vector<16x96xf32>
    %33 = tpu.concatenate %24, %27, %32 in 1 : vector<16x16xf32>, vector<16x16xf32>, vector<16x96xf32> -> vector<16x128xf32>
    %34 = arith.truncf %33 : vector<16x128xf32> to vector<16x128xbf16>
    %c0_16 = arith.constant 0 : index
    %c0_17 = arith.constant 0 : index
    %c128 = arith.constant 128 : index
    %35 = vector.load %arg6[%c0_16, %c0_17, %c128] : memref<1x16x256xbf16, #tpu.memory_space<vmem>>, vector<1x16x128xbf16>
    %36 = vector.shape_cast %35 : vector<1x16x128xbf16> to vector<16x128xbf16>
    %37 = vector.shape_cast %34 : vector<16x128xbf16> to vector<1x16x128xbf16>
    tpu.vector_store %arg6[%c0_16, %c0_17, %c128], %37 {strides = array<i32>} : memref<1x16x256xbf16, #tpu.memory_space<vmem>>, vector<1x16x128xbf16>,
    return
  }
  func.func @transform_0(%arg0: i32, %arg1: i32) -> (i32, i32, i32) {
    %c0_i32 = arith.constant 0 : i32
    %c0_i32_0 = arith.constant 0 : i32
    return %arg0, %arg1, %c0_i32 : i32, i32, i32
  }
  func.func @transform_1(%arg0: i32, %arg1: i32) -> (i32, i32) {
    %c0_i32 = arith.constant 0 : i32
    %c0_i32_0 = arith.constant 0 : i32
    %c0_i32_1 = arith.constant 0 : i32
    return %c0_i32, %c0_i32_0 : i32, i32
  }
  func.func @transform_2(%arg0: i32, %arg1: i32) -> (i32, i32) {
    %c0_i32 = arith.constant 0 : i32
    %c0_i32_0 = arith.constant 0 : i32
    %c0_i32_1 = arith.constant 0 : i32
    return %c0_i32, %c0_i32_0 : i32, i32
  }
  func.func @transform_3(%arg0: i32, %arg1: i32) -> (i32, i32) {
    %c0_i32 = arith.constant 0 : i32
    %c0_i32_0 = arith.constant 0 : i32
    return %arg1, %c0_i32 : i32, i32
  }
  func.func @transform_4(%arg0: i32, %arg1: i32) -> (i32, i32, i32) {
    %c0_i32 = arith.constant 0 : i32
    %c0_i32_0 = arith.constant 0 : i32
    return %arg0, %arg1, %c0_i32 : i32, i32, i32
  }
}

</mosaic_0001>

<bundles_post_ra>
// kernel: tpu_custom_call.1
= control target key start
LH: loop header
LB: loop body
LE: loop exit
PB: predicated region body
PF: predicated region fallthrough
CT: control target
= control target key end

     0   :  { %9 = vsyncpa [#allocation3], 0  ;;  %s1300_s0 = inlined_call_operand.vmem [shape: bf16[2,32,256], index: 0, kind: input, shape index: {}]   ;;  %s1301_s1 = inlined_call_operand.vmem [shape: bf16[256,160], index: 1, kind: input, shape index: {}]   ;;  %s1302_s2 = inlined_call_operand.vmem [shape: f32[1,128], index: 2, kind: input, shape index: {}]   ;;  %s1303_s3 = inlined_call_operand.vmem [shape: f32[32,128], index: 3, kind: input, shape index: {}]   ;;  %s1304_s4 = inlined_call_operand.hbm [shape: bf16[2,32,256], index: 4, kind: output, shape index: {}]  }
   0x1   :  { %11 = vsyncpa [#allocation3 + $0x1], 0  ;;  %s1037_s15 = smov 0   ;;  %s1039_s16 = smov 0  }
   0x2   :  { %s1041_s17 = smov 0   ;;  %s1043_s18 = smov 0  }
   0x3   :  { %s1045_s19 = smov 0   ;;  %s1047_s20 = smov 0  }
   0x4   :  { %s1049_s21 = smov 0   ;;  %s1051_s22 = smov 0  }
   0x5 LB: > { %s713_s23 = sadd.s32 4294967295, %s1005_s22   ;;  %s714_s24 = sadd.s32 4294967294, %s1005_s22   ;;  %s1005_s22 = sphi %s1051_s22, %s17_s22   ;;  %s1001_s21 = sphi %s1049_s21, %s1316_s21   ;;  %s997_s20 = sphi %s1047_s20, %s1315_s20   ;;  %s993_s19 = sphi %s1045_s19, %s1314_s19   ;;  %s989_s18 = sphi %s1043_s18, %s1313_s18   ;;  %s985_s17 = sphi %s1041_s17, %s1312_s17   ;;  %s981_s16 = sphi %s1039_s16, %s1311_s16   ;;  %s977_s15 = sphi %s1037_s15, %s1310_s15  }
   0x6   : > { %s26_s25 = sadd.s32 1, %s997_s20  ;;  %s29_s26 = sadd.s32 1, %s1001_s21 }
   0x7   : > { %p27_p0 = scmp.ge.s32.totalorder %s26_s25, 2  ;;  %p144_p1 = scmp.ne.s32.totalorder %s985_s17, %s981_s16 }
   0x8   : > { %p145_p2 = scmp.eq.s32.totalorder %s713_s23, 3  ;;  %p150_p5 = scmp.ne.s32.totalorder %s981_s16, %s977_s15 }
   0x9   : > { %s1318_s25 = smov (%p27_p0, %s26_s25), 0  ;;  %s1320_s26 = smov (!%p27_p0, %s29_s26), %s1001_s21 }
   0xa   : > { %s130_s27 = ssub.s32 %s997_s20, %s1318_s25  ;;  %p1088_p3 = por %p145_p2, %p144_p1 }
   0xb   : > { %p31_p4 = scmp.ge.s32.totalorder %s1320_s26, 2  ;;  %p151_p6 = scmp.eq.s32.totalorder %s714_s24, 3 }
   0xc   : > { %p717_p7 = scmp.ge.s32.totalorder %s1005_s22, 1  ;;  %p198_p9 = scmp.lt.s32.totalorder %s1005_s22, 5 }
   0xd   : > { %s1322_s26 = smov (%p31_p4, %s1320_s26), 0  ;;  %p1097_p8 = por %p151_p6, %p150_p5 }
   0xe   : > { %1307 = sst [smem:[#allocation5_spill]] %s1322_s26  ;;  %s129_s30 = ssub.s32 %s1001_s21, %s1322_s26 }
   0xf   : > { %s134_s5 = sadd.s32 1, %s985_s17  ;;  %s131_s6 = sor.u32 %s130_s27, %s129_s30 }
  0x10   : > { %p199_p10 = pnand %p717_p7, %p198_p9  ;;  %p132_p11 = scmp.eq.s32.totalorder %s131_s6, 0 }
  0x11   : > { %v856_v0 = vld [vmem:[%s1301_s1 + $0x4] ss:$8 sps:$4 sm:$0xff] (!%p199_p10)   ;;  %s719_s10 = sshll.u32 (!%p199_p10), %s989_s18, 1  ;;  %v858_v1 = vld [vmem:[%s1301_s1] ss:$8 sps:$4 sm:$0xff] (!%p199_p10)   ;;  %p235_p12 = scmp.lt.s32.totalorder (!%p199_p10), %s993_s19, 1 }
  0x12   : > { %s1106_s7 = scalar_select %p132_p11, %s985_s17, %s134_s5  }
  0x13   : > { %202 = sbr.rel (%p199_p10) target bundleno = 555 (0x22b), region = 36  ;;  %456 = vmatprep.subr.bf16.mxu0 (!%p199_p10), %v856_v0  ;;  %v859_v2 = vld [vmem:[%s1301_s1 + $0x14] ss:$8 sps:$4 sm:$0xff] (!%p199_p10)   ;;  %p237_p13 = scmp.lt.s32.totalorder (!%p199_p10), %s719_s10, 3  ;;  %v861_v3 = vld [vmem:[%s1301_s1 + $0x10] ss:$8 sps:$4 sm:$0xff] (!%p199_p10)  }
  0x14   : > { %457 = vmatpush1.bf16.msra.mxu0 (!%p199_p10), %v858_v1  ;;  %v862_v4 = vld [vmem:[%s1301_s1 + $0x24] ss:$8 sps:$4 sm:$0xff] (!%p199_p10)   ;;  %v864_v5 = vld [vmem:[%s1301_s1 + $0x20] ss:$8 sps:$4 sm:$0xff] (!%p199_p10)   ;;  %v865_v6 = vld [vmem:[%s1301_s1 + $0x34] ss:$8 sps:$4 sm:$0xff] (!%p199_p10)  }
  0x15   : > { %458 = vmatprep.subr.bf16.mxu0 (!%p199_p10), %v859_v2  ;;  %v867_v7 = vld [vmem:[%s1301_s1 + $0x30] ss:$8 sps:$4 sm:$0xff] (!%p199_p10)   ;;  %v868_v8 = vld [vmem:[%s1301_s1 + $0x44] ss:$8 sps:$4 sm:$0xff] (!%p199_p10)   ;;  %v870_v9 = vld [vmem:[%s1301_s1 + $0x40] ss:$8 sps:$4 sm:$0xff] (!%p199_p10)  }
  0x16   : > { %v871_v10 = vld [vmem:[%s1301_s1 + $0x54] ss:$8 sps:$4 sm:$0xff] (!%p199_p10)   ;;  %v873_v11 = vld [vmem:[%s1301_s1 + $0x50] ss:$8 sps:$4 sm:$0xff] (!%p199_p10)   ;;  %v874_v12 = vld [vmem:[%s1301_s1 + $0x64] ss:$8 sps:$4 sm:$0xff] (!%p199_p10)  }
  0x17   : > { %v876_v15 = vld [vmem:[%s1301_s1 + $0x60] ss:$8 sps:$4 sm:$0xff] (!%p199_p10)   ;;  %v877_v16 = vld [vmem:[%s1301_s1 + $0x74] ss:$8 sps:$4 sm:$0xff] (!%p199_p10)   ;;  %s1008_s23 = smov (!%p199_p10), 16   ;;  %s775_s6 = sshll.u32 (!%p199_p10), %s989_s18, 2 }
  0x18   : > { %459 = vmatpush1.bf16.msra.mxu0 (!%p199_p10), %v861_v3  ;;  %v879_v18 = vld [vmem:[%s1301_s1 + $0x70] ss:$8 sps:$4 sm:$0xff] (!%p199_p10)   ;;  %v880_v19 = vld [vmem:[%s1301_s1 + $0x84] ss:$8 sps:$4 sm:$0xff] (!%p199_p10)   ;;  %v882_v20 = vld [vmem:[%s1301_s1 + $0x80] ss:$8 sps:$4 sm:$0xff] (!%p199_p10)  }
  0x19   : > { %460 = vmatprep.subr.bf16.mxu0 (!%p199_p10), %v862_v4  ;;  %v883_v21 = vld [vmem:[%s1301_s1 + $0x94] ss:$8 sps:$4 sm:$0xff] (!%p199_p10)   ;;  %v885_v22 = vld [vmem:[%s1301_s1 + $0x90] ss:$8 sps:$4 sm:$0xff] (!%p199_p10)   ;;  %v886_v23 = vld [vmem:[%s1301_s1 + $0xa4] ss:$8 sps:$4 sm:$0xff] (!%p199_p10)  }
  0x1a   : > { %s236_s5 = scalar_select %p235_p12, %s993_s19, 1  ;;  %v888_v24 = vld [vmem:[%s1301_s1 + $0xa0] ss:$8 sps:$4 sm:$0xff]   ;;  %v889_v25 = vld [vmem:[%s1301_s1 + $0xb4] ss:$8 sps:$4 sm:$0xff]   ;;  %vm583_vm0 = vcmask 130048  }
  0x1b   : > { %s1324_s10 = smov (!%p237_p13, %s719_s10), 3  ;;  %v891_v26 = vld [vmem:[%s1301_s1 + $0xb0] ss:$8 sps:$4 sm:$0xff]   ;;  %v892_v27 = vld [vmem:[%s1301_s1 + $0xc4] ss:$8 sps:$4 sm:$0xff]   ;;  %vm586_vm1 = vcmask 261120  }
  0x1c   : > { %s720_s12 = sshll.u32 %s1324_s10, 1  ;;  %s721_s13 = sshll.u32 %s236_s5, 3  ;;  %461 = vmatpush1.bf16.msra.mxu0 %v864_v5  ;;  %v894_v28 = vld [vmem:[%s1301_s1 + $0xc0] ss:$8 sps:$4 sm:$0xff]   ;;  %v895_v29 = vld [vmem:[%s1301_s1 + $0xd4] ss:$8 sps:$4 sm:$0xff]  }
  0x1d   : > { %462 = vmatprep.subr.bf16.mxu0 %v865_v6  ;;  %s241_s30 = sadd.s32 %s721_s13, %s720_s12  ;;  %s724_s26 = sshll.u32 %s1324_s10, 3  ;;  %v897_v30 = vld [vmem:[%s1301_s1 + $0xd0] ss:$8 sps:$4 sm:$0xff]   ;;  %v898_v31 = vld [vmem:[%s1301_s1 + $0xe4] ss:$8 sps:$4 sm:$0xff]  }
  0x1e   : > { %s722_s5 = sshll.u32 %s241_s30, 2  ;;  %s249_s8 = scalar_lea.vmem %s1303_s3, %s724_s26  ;;  %v900_v32 = vld [vmem:[%s1301_s1 + $0xe0] ss:$8 sps:$4 sm:$0xff]   ;;  %v901_v33 = vld [vmem:[%s1301_s1 + $0xf4] ss:$8 sps:$4 sm:$0xff]  }
  0x1f   : > { %s1150_s12 = scalar_lea.vmem %s1300_s0, %s722_s5  ;;  %v1159_v14 = vld [vmem:[%s249_s8] sm:$0xff]  ;;  %s1007_s5 = smov 112   ;;  %v524_v17 = vld [vmem:[%s249_s8 + $0x8] sm:$0xff]  ;;  %v903_v34 = vld [vmem:[%s1301_s1 + $0xf0] ss:$8 sps:$4 sm:$0xff]  }
  0x20   : > { %463 = vmatpush1.bf16.msra.mxu0 %v867_v7  ;;  %v906_v13 = vld [vmem:[%s1150_s12 + $0x4] ss:$8 sps:$4 sm:$0xff]   ;;  %539 = vrot.lane.b32.xlu1 %v1159_v14, %s1007_s5  ;;  %v904_v35 = vld [vmem:[%s1150_s12] ss:$8 sps:$4 sm:$0xff]   ;;  %s231_s12 = sand.u32 1, %s981_s16   ;;  %s767_s8 = sshll.u32 %s993_s19, 3 }
  0x21   : > { %464 = vmatprep.subr.bf16.mxu0 %v868_v8  ;;  %488 = vmatprep.mubr.bf16.mxu0 %v906_v13  ;;  %v759_v0 = vld [vmem:[%s1302_s2] ss:$0 sm:$0xff]  ;;  %s718_s13 = sshll.u32 %s231_s12, 4  ;;  %s613_s9 = sadd.s32 %s775_s6, %s767_s8 }
  0x22   : > { %547 = vrot.lane.b32.xlu0 %v1159_v14, %s1008_s23  ;;  %s768_s11 = sshll.u32 %s613_s9, 6  ;;  %s1248_s14 = scalar_lea.sflag [#allocation3], %s231_s12 }
  0x23   : > { %s1242_s30 = scalar_lea.hbm %s1304_s4, %s768_s11  ;;  %s1009_s24 = smov [#allocation2]  }
  0x24   : > { %465 = vmatpush1.bf16.msra.mxu0 %v870_v9  ;;  %541 = vrot.lane.b32.xlu1 %v524_v17, %s1007_s5 }
  0x25   : > { %466 = vmatprep.subr.bf16.mxu0 %v871_v10 }
  0x26   : > { %549 = vrot.lane.b32.xlu0 %v524_v17, %s1008_s23 }
  0x28   : > { %467 = vmatpush1.bf16.msra.mxu0 %v873_v11 }
  0x29   : > { %468 = vmatprep.subr.bf16.mxu0 %v874_v12 }
  0x2c   : > { %469 = vmatpush1.bf16.msra.mxu0 %v876_v15 }
  0x2d   : > { %470 = vmatprep.subr.bf16.mxu0 %v877_v16 }
  0x30   : > { %471 = vmatpush1.bf16.msra.mxu0 %v879_v18 }
  0x31   : > { %472 = vmatprep.subr.bf16.mxu0 %v880_v19 }
  0x34   : > { %473 = vmatpush1.bf16.msra.mxu0 %v882_v20 }
  0x35   : > { %474 = vmatprep.subr.bf16.mxu0 %v883_v21 }
  0x38   : > { %475 = vmatpush1.bf16.msra.mxu0 %v885_v22 }
  0x39   : > { %476 = vmatprep.subr.bf16.mxu0 %v886_v23 }
  0x3c   : > { %477 = vmatpush1.bf16.msra.mxu0 %v888_v24 }
  0x3d   : > { %478 = vmatprep.subr.bf16.mxu0 %v889_v25 }
  0x40   : > { %479 = vmatpush1.bf16.msra.mxu0 %v891_v26 }
  0x41   : > { %480 = vmatprep.subr.bf16.mxu0 %v892_v27 }
  0x44   : > { %481 = vmatpush1.bf16.msra.mxu0 %v894_v28 }
  0x45   : > { %482 = vmatprep.subr.bf16.mxu0 %v895_v29 }
  0x48   : > { %483 = vmatpush1.bf16.msra.mxu0 %v897_v30 }
  0x49   : > { %484 = vmatprep.subr.bf16.mxu0 %v898_v31 }
  0x4c   : > { %485 = vmatpush1.bf16.msra.mxu0 %v900_v32 }
  0x4d   : > { %486 = vmatprep.subr.bf16.mxu0 %v901_v33 }
  0x50   : > { %487 = vmatpush1.bf16.msra.mxu0 %v903_v34 }
  0x53   : > { %489 = vmatmul.mubr.bf16.vlgmr.msra.gmra.mrb[0].mxu0 %v904_v35 }
  0x92   : > { %v540_v48 = vpop.permute.xlu1 %539 }
  0x94   : > { %v548_v36 = vpop.permute.xlu0 %547 }
  0x96   : > { %v542_v49 = vpop.permute.xlu1 %541 }
  0x98   : > { %v550_v39 = vpop.permute.xlu0 %549 }
 0x126   : > { %v490_v37 = vpop.f32.mrb[0].mxu0 }
 0x127   : > { %v492_v38 = vpop.f32.mrb[1].mxu0  ;;  %v499_v44 = vmul.f32 %v490_v37, %v490_v37 }
 0x128   : > { %v553_v40 = vmul.f32 %v548_v36, %v492_v38  ;;  %v494_v41 = vpop.f32.mrb[2].mxu0  ;;  %v525_v46 = vmul.f32 %v1159_v14, %v492_v38  ;;  %v545_v52 = vmul.f32 %v540_v48, %v492_v38 }
 0x129   : > { %v496_v42 = vpop.f32.mrb[3].mxu0  ;;  %v500_v45 = vmul.f32 %v494_v41, %v494_v41 }
 0x12a   : > { %v554_v43 = vmul.f32 %v550_v39, %v496_v42  ;;  %557 = vrot.lane.b32.xlu0 %v553_v40, %s1007_s5  ;;  %v526_v47 = vmul.f32 %v524_v17, %v496_v42  ;;  %v546_v51 = vmul.f32 %v542_v49, %v496_v42 }
 0x12c   : > { %559 = vrot.lane.b32.xlu1 %v554_v43, %s1007_s5 }
 0x149   : > { %501 = vadd.xlane.f32.xlu0 %v499_v44 }
 0x150   : > { %503 = vadd.xlane.f32.xlu1 %v500_v45 }
 0x15f   : > { %529 = vrot.lane.b32.xlu0 %v525_v46, %s1007_s5 }
 0x161   : > { %531 = vrot.lane.b32.xlu1 %v526_v47, %s1007_s5  ;;  %s915_s5 = sshll.u32 %s1009_s24, 4  ;;  %s916_s5 = int_to_ptr.vmem [resolvable:$false] %s915_s5 }
 0x162   : > { %s917_s27 = scalar_lea.vmem %s916_s5, 512 }
 0x19c   : > { %v558_v50 = vpop.permute.xlu0 %557 }
 0x19d   : > { %v563_v54 = vadd.f32 %v558_v50, %v545_v52 }
 0x19e   : > { %v560_v53 = vpop.permute.xlu1 %559 }
 0x19f   : > { %v564_v55 = vadd.f32 %v560_v53, %v546_v51 }
 0x1a1   : > { %v851_v56 = vpack.i.bf16 %v564_v55, %v563_v54 }
 0x1a3   : > { %852 = vrot.lane.b32.xlu0 %v851_v56, %s1008_s23  ;;  %s233_s23 = scalar_lea.vmem [#allocation2], %s718_s13 }
 0x1a4   : > { %s616_s10 = sshll.u32 %s233_s23, 4  ;;  %s1244_s10 = int_to_ptr.vmem [resolvable:$true] %s616_s10 }
 0x1a5   : > { %s911_s26 = scalar_lea.vmem %s1244_s10, 256  ;;  %p918_p4 = scmp.lt.s32.totalorder %s1244_s10, %s916_s5 }
 0x1a6   : > { %p912_p0 = scmp.ne.s32.totalorder %s1244_s10, %s911_s26  ;;  %p919_p5 = scmp.lt.s32.totalorder %s917_s27, %s911_s26 }
 0x1a8   : > { %p913_p1 = pnand %p912_p0, %p1088_p3  ;;  %p920_p6 = por %p919_p5, %p918_p4 }
 0x1aa   : > { %p914_p2 = pneg %p913_p1 }
 0x1ac   : > { %p921_p7 = pnand %p920_p6, %p914_p2 }
 0x1d6   : > { %v502_v57 = vpop.xlane.xlu0 %501 }
 0x1d7   : > { %v506_v58 = vmul.f32 0.0078125, %v502_v57 }
 0x1d9   : > { %v508_v59 = vadd.f32 1e-06, %v506_v58 }
 0x1da   : > { %v530_v8 = vpop.permute.xlu0 %529 }
 0x1db   : > { %907 = vrsqrt.f32 %v508_v59  ;;  %v535_v11 = vsub.f32 %v525_v46, %v530_v8 }
 0x1dd   : > { %v504_v60 = vpop.xlane.xlu1 %503 }
 0x1de   : > { %v507_v61 = vmul.f32 0.0078125, %v504_v60 }
 0x1e0   : > { %v509_v62 = vadd.f32 1e-06, %v507_v61 }
 0x1e1   : > { %v532_v9 = vpop.permute.xlu1 %531 }
 0x1e2   : > { %909 = vrsqrt.f32 %v509_v62  ;;  %v536_v12 = vsub.f32 %v526_v47, %v532_v9 }
 0x1e5   : > { %v908_v63 = vpop.eup %907 }
 0x1e6   : > { %v512_v1 = vmul.f32 %v908_v63, %v490_v37 }
 0x1e8   : > { %v521_v2 = vmul.f32 %v759_v0, %v512_v1 }
 0x1ea   : > { %v771_v3 = vpack.c.bf16 %v521_v2, %v521_v2 }
 0x1ec   : > { %v910_v4 = vpop.eup %909  ;;  %573 = vst [vmem:[%s233_s23] sm:$0xf] %v771_v3 }
 0x1ed   : > { %v513_v5 = vmul.f32 %v910_v4, %v494_v41 }
 0x1ef   : > { %v522_v6 = vmul.f32 %v759_v0, %v513_v5 }
 0x1f1   : > { %v772_v7 = vpack.c.bf16 %v522_v6, %v522_v6 }
 0x1f3   : > { %574 = vst [vmem:[%s233_s23 + $0x8] sm:$0xf] %v772_v7 }
 0x215   : > { %v853_v10 = vpop.permute.xlu0 %852 }
 0x216   : > { %v855_v13 = vunpack.i.h.bf16 %v853_v10  ;;  %v854_v14 = vunpack.i.l.bf16 %v853_v10 }
 0x218   : > { %v584_v15 = vsel %vm583_vm0, %v535_v11, %v854_v14  ;;  %v585_v16 = vsel %vm583_vm0, %v536_v12, %v855_v13 }
 0x219   : > { %v587_v17 = vsel %vm586_vm1, %v584_v15, 0.0  ;;  %v588_v18 = vsel %vm586_vm1, %v585_v16, 0.0 }
 0x21a   : > { %v773_v19 = vpack.c.bf16 %v587_v17, %v587_v17  ;;  %v774_v20 = vpack.c.bf16 %v588_v18, %v588_v18 }
 0x21c   : > { %597 = vst [vmem:[%s233_s23 + $0x4] sm:$0xf] %v773_v19  ;;  %598 = vst [vmem:[%s233_s23 + $0xc] sm:$0xf] %v774_v20 }
 0x21d   : > { %924 = shalt.err (!%p921_p7)
}
 0x21e   : > { %s925_s12 = scalar_lea.hbm %s1242_s30, 256  ;;  %s929_s6 = scalar_lea.hbm %s1304_s4, 1024 }
 0x21f   : > { %p926_p9 = scmp.ne.s32.totalorder %s1242_s30, %s925_s12  ;;  %p930_p12 = scmp.lt.u32.totalorder %s1242_s30, %s1304_s4 }
 0x220   : > { %p931_p13 = scmp.lt.u32.totalorder %s929_s6, %s925_s12  ;;  %p933_p1 = scmp.lt.u32.totalorder %s925_s12, %s1242_s30 }
 0x221   : > { %p927_p10 = pnand %p926_p9, %p1088_p3 }
 0x222   : > { %p932_p0 = por %p931_p13, %p930_p12 }
 0x223   : > { %p928_p11 = pneg %p927_p10 }
 0x224   : > { %p934_p2 = por %p933_p1, %p932_p0 }
 0x226   : > { %p935_p4 = pnand %p934_p2, %p928_p11 }
 0x228   : > { %938 = shalt.err (!%p935_p4)
}
 0x229   : > { %s1010_s11 = smov 128   ;;  %s1011_s18 = smov 8  }
 0x22a   : > { %776 = dma.vmem_to_hbm [thread:$0]  (%p1088_p3), %s1244_s10, 256, %s1242_s30, %s1248_s14, %s1010_s11, %s1010_s11, %s1011_s18  }
 0x22b PF: > { %p782_p5 = scmp.ge.s32.totalorder %s1005_s22, 2  ;;  %s631_s19 = sand.u32 1, %s977_s15  }
 0x22c   : > { %s632_s26 = scalar_lea.sflag [#allocation3], %s631_s19 }
 0x22d   : > { %p779_p6 = pnand %p782_p5, %p1097_p8 }
 0x22f   : > { %972 = dma.done.wait (!%p779_p6), %s632_s26, 256  }
 0x230   : > { %974 = vsyncadd (!%p779_p6), %s632_s26, 4294967040  ;;  %s17_s22 = sadd.s32 1, %s1005_s22   ;;  %s1309_s28 = sld [smem:[#allocation5_spill]] }
 0x231   : > { %p14_p7 = scmp.ge.s32.totalorder %s17_s22, 6   ;;  %s1310_s15 = smov %s981_s16 }
 0x232   : > { %s1311_s16 = smov %s985_s17  ;;  %s1312_s17 = smov %s1106_s7 }
 0x233   : > { %s1313_s18 = smov %s997_s20  ;;  %s1314_s19 = smov %s1001_s21 }
 0x234   : > { %s1315_s20 = smov %s1318_s25  ;;  %16 = sbr.rel (!%p14_p7) target bundleno = 5 (0x5), region = 74 }
 0x236   : > { %s1316_s21 = smov %s1309_s28 }
 0x23b   :  { %637 = vsyncpa [#allocation3], 1 }
 0x23c   :  { %639 = vsyncpa [#allocation3 + $0x1], 1 }

</bundles_post_ra>
